<compile_context>
chip_gen: v7x
topology: tpu7x:2x2x1
jax: 0.10.0
libtpu: 0.0.40
codegen_flags: <defaults>
</compile_context>

<pallas_src>
import functools
import math
from collections import OrderedDict

import jax
import jax.numpy as jnp
from jax.experimental import pallas as pl
from jax.experimental.pallas import tpu as pltpu


def _round_up(x, m):
    return (x + m - 1) // m * m


# ----------------------------------------------------------------------------
# Fused per-head kernel. One grid step == one hypernetwork head: the full
# FCBlock (first layer, hidden layers, outermost linear) runs with the
# (B_pad, hid) activations living entirely in vregs/VMEM.
# ----------------------------------------------------------------------------
def _fused_hypernet_kernel(*refs, num_layers):
    z_ref = refs[0]
    o_ref = refs[-1]
    wb = refs[1:-1]                     # alternating (w, b) refs, per-head blocks
    x = z_ref[...]                      # f32 (B_pad, in)
    for i in range(num_layers):
        w = wb[2 * i][0]                # bf16 (in, out)  -- pre-transposed
        b = wb[2 * i + 1][0]            # f32  (1, out)
        acc = jnp.dot(x.astype(jnp.bfloat16), w,
                      preferred_element_type=jnp.float32)
        x = acc + b                     # f32 epilogue (bias add)
        if i < num_layers - 1:          # ReLU on all but the last layer
            x = jnp.maximum(x, 0.0)
    o_ref[...] = x.astype(o_ref.dtype)


def fused_hypernet_forward(z, stacked_layers, num_heads, out_pad):
    """Single pallas_call computing every hypo-parameter head from z.

    z:              (B, hyper_in) f32
    stacked_layers: list of (W, B) with W: (H, in, out) bf16, B: (H, 1, out) f32
    Returns an f32 slab (B_pad, H * out_pad); head h owns columns
    [h*out_pad, h*out_pad + out_h).
    """
    B, in_f = z.shape
    B_pad = max(_round_up(B, 8), 8)                 # f32 sublane alignment
    if B_pad != B:
        z = jnp.pad(z, ((0, B_pad - B), (0, 0)))

    num_layers = len(stacked_layers)
    flat = []
    in_specs = [pl.BlockSpec((B_pad, in_f), lambda h: (0, 0))]   # resident input

    flops = 0
    bytes_acc = B_pad * in_f * 4 + B_pad * num_heads * out_pad * 4
    per_step_bytes = B_pad * in_f * 4 + 2 * B_pad * out_pad * 4
    for w, b in stacked_layers:
        flat.extend([w, b])
        in_specs.append(pl.BlockSpec((1,) + tuple(w.shape[1:]),
                                     lambda h: (h, 0, 0)))
        in_specs.append(pl.BlockSpec((1,) + tuple(b.shape[1:]),
                                     lambda h: (h, 0, 0)))
        flops += 2 * B_pad * int(w.shape[0]) * int(w.shape[1]) * int(w.shape[2])
        bytes_acc += w.size * w.dtype.itemsize + b.size * b.dtype.itemsize
        # double-buffered per-head weight/bias blocks
        per_step_bytes += 2 * (int(w.shape[1]) * int(w.shape[2]) * 2
                               + int(b.shape[1]) * int(b.shape[2]) * 4)

    vmem_limit = int(min(max(4 << 20, 4 * per_step_bytes), 48 << 20))

    return pl.pallas_call(
        functools.partial(_fused_hypernet_kernel, num_layers=num_layers),
        grid=(num_heads,),
        in_specs=in_specs,
        out_specs=pl.BlockSpec((B_pad, out_pad), lambda h: (0, h)),
        out_shape=jax.ShapeDtypeStruct((B_pad, num_heads * out_pad), jnp.float32),
        compiler_params=pltpu.CompilerParams(
            dimension_semantics=("parallel",),      # heads split across TCs (v7x)
            vmem_limit_bytes=vmem_limit),
        cost_estimate=pl.CostEstimate(
            flops=int(flops), transcendentals=0, bytes_accessed=int(bytes_acc)),
    )(z, *flat)


# ----------------------------------------------------------------------------
# Deterministic parameter initialisation (mirrors the torch inits in spirit).
# Weights are generated directly in pre-transposed (in, out) layout.
# ----------------------------------------------------------------------------
def _kaiming_normal_T(key, in_f, out_f, scale=1.0):
    std = math.sqrt(2.0 / in_f) * scale           # kaiming_normal, fan_in, relu
    return std * jax.random.normal(key, (in_f, out_f), dtype=jnp.float32)


def _default_bias(key, out_f, in_f):
    bound = 1.0 / math.sqrt(in_f)                 # torch.nn.Linear default
    return jax.random.uniform(key, (out_f,), jnp.float32, -bound, bound)


# ----------------------------------------------------------------------------
# HyperNetwork
# ----------------------------------------------------------------------------
class HyperNetworkPallas:
    def __init__(self, hyper_in_features, hyper_hidden_layers,
                 hyper_hidden_features, hypo_param_shapes, key):
        """hypo_param_shapes: OrderedDict name -> shape tuple (the hypo
        module's state_dict shapes, built synthetically in-script)."""
        self.names = []
        self.param_shapes = []
        self.out_sizes = []
        last_scales = []
        for name, shape in hypo_param_shapes.items():
            if 'variance' in name:
                continue
            self.names.append(name)
            shape = tuple(int(s) for s in shape)
            self.param_shapes.append(shape)
            out_f = 1
            for s in shape:
                out_f *= s
            self.out_sizes.append(out_f)
            # hyper_weight_init / hyper_bias_init both divide the last-layer
            # weight by 10 (bias keeps default init).
            scale = 0.1 if (('weight' in name) or ('bias' in name)
                            or ('offsets' in name)) else 1.0
            last_scales.append(scale)

        H = len(self.names)
        hid = hyper_hidden_features
        self.num_heads = H
        # Per-head lane-aligned output width (same for all heads so the grid
        # block shape is static); padded columns carry zero weight/bias.
        self.out_pad = max(_round_up(max(self.out_sizes), 128), 128)

        # --- per-head parameter init (f32, kept for the reference check) ----
        self.per_head_layers = []   # list over heads of list of (w, b)
        for h in range(H):
            key, sub = jax.random.split(key)
            ks = jax.random.split(sub, 2 * (hyper_hidden_layers + 2))
            layers_h = []
            # first layer: hyper_in -> hidden
            layers_h.append((_kaiming_normal_T(ks[0], hyper_in_features, hid),
                             _default_bias(ks[1], hid, hyper_in_features)))
            # hidden layers: hidden -> hidden
            for m in range(hyper_hidden_layers):
                layers_h.append((_kaiming_normal_T(ks[2 + 2 * m], hid, hid),
                                 _default_bias(ks[3 + 2 * m], hid, hid)))
            # last layer: hidden -> out_h (outermost_linear=True, scaled)
            layers_h.append((_kaiming_normal_T(ks[-2], hid, self.out_sizes[h],
                                               scale=last_scales[h]),
                             _default_bias(ks[-1], self.out_sizes[h], hid)))
            self.per_head_layers.append(layers_h)

        # --- stack per head (no block-diagonal / dense zero padding) --------
        stacked = []
        # first layer: (H, hyper_in, hid) bf16, bias (H, 1, hid) f32
        w0 = jnp.stack([self.per_head_layers[h][0][0] for h in range(H)])
        b0 = jnp.stack([self.per_head_layers[h][0][1].reshape(1, -1)
                        for h in range(H)])
        stacked.append((w0.astype(jnp.bfloat16), b0))
        # hidden layers: (H, hid, hid) bf16 each
        for m in range(hyper_hidden_layers):
            wm = jnp.stack([self.per_head_layers[h][1 + m][0] for h in range(H)])
            bm = jnp.stack([self.per_head_layers[h][1 + m][1].reshape(1, -1)
                            for h in range(H)])
            stacked.append((wm.astype(jnp.bfloat16), bm))
        # last layer: (H, hid, out_pad) bf16, zero-padded lanes per head
        wl_parts, bl_parts = [], []
        for h in range(H):
            n = self.out_sizes[h]
            w_h, b_h = self.per_head_layers[h][-1]
            w_pad = jnp.zeros((hid, self.out_pad), jnp.float32).at[:, :n].set(w_h)
            b_pad = jnp.zeros((self.out_pad,), jnp.float32).at[:n].set(b_h)
            wl_parts.append(w_pad)
            bl_parts.append(b_pad.reshape(1, -1))
        stacked.append((jnp.stack(wl_parts).astype(jnp.bfloat16),
                        jnp.stack(bl_parts)))
        self.stacked_layers = stacked

    def forward(self, z_motion, z_color, z_mask=None):
        # Faithful to the original truthiness quirk: every param is predicted
        # from z_color ('mapping' elif unreachable; the 'alpha' branch result
        # is overwritten by identical compute, so each head runs once).
        del z_motion, z_mask  # dead inputs, kept for signature parity
        B = z_color.shape[0]
        slab = fused_hypernet_forward(z_color, self.stacked_layers,
                                      self.num_heads, self.out_pad)
        params = OrderedDict()
        for h, (name, shape, n) in enumerate(zip(self.names, self.param_shapes,
                                                 self.out_sizes)):
            col = h * self.out_pad        # lane-aligned per-head offset
            params[name] = slab[:B, col:col + n].reshape((-1,) + shape)
        return params

    # Pure-JAX per-head reference (no Pallas), using identical bf16-weight /
    # bf16-activation / f32-accumulation numerics, for correctness checking.
    def reference_forward(self, z_color):
        params = OrderedDict()
        for name, shape, layers in zip(self.names, self.param_shapes,
                                       self.per_head_layers):
            x = z_color
            n = len(layers)
            for i, (w, b) in enumerate(layers):
                y = jnp.dot(x.astype(jnp.bfloat16), w.astype(jnp.bfloat16),
                            preferred_element_type=jnp.float32)
                x = y + b[None, :].astype(jnp.float32)
                if i < n - 1:
                    x = jnp.maximum(x, 0.0)
            params[name] = x.reshape((-1,) + shape)
        return params


# ----------------------------------------------------------------------------
if __name__ == "__main__":
    key = jax.random.PRNGKey(0)

    # Small hypernetwork configuration.
    B = 2
    hyper_in_features = 32
    hyper_hidden_layers = 1
    hyper_hidden_features = 64

    # Synthetic hypo-module state_dict shapes (a tiny FCBlock: 2 -> 8 -> 3),
    # plus a 'variance' entry that the HyperNetwork skips.
    hypo_param_shapes = OrderedDict([
        ("net.0.0.weight", (8, 2)),
        ("net.0.0.bias", (8,)),
        ("net.1.0.weight", (3, 8)),
        ("net.1.0.bias", (3,)),
        ("log_variance", (1,)),
    ])

    key, k_init, k_zc, k_zm = jax.random.split(key, 4)
    hypernet = HyperNetworkPallas(hyper_in_features, hyper_hidden_layers,
                                  hyper_hidden_features, hypo_param_shapes,
                                  k_init)

    z_color = jax.random.normal(k_zc, (B, hyper_in_features), jnp.float32)
    z_motion = jax.random.normal(k_zm, (B, hyper_in_features), jnp.float32)

    out_params = hypernet.forward(z_motion, z_color)
    ref_params = hypernet.reference_forward(z_color)

    assert "log_variance" not in out_params          # 'variance' names skipped
    for name, val in out_params.items():
        val = jax.block_until_ready(val)
        expected = (B,) + hypo_param_shapes[name]
        assert tuple(val.shape) == expected, (name, val.shape, expected)
        ref = ref_params[name]
        err = float(jnp.max(jnp.abs(val - ref)))
        assert bool(jnp.allclose(val, ref, rtol=1e-2, atol=1e-3)), (name, err)

    print("KERNEL_OK")
</pallas_src>

<mosaic_0001>
module attributes {stable_mosaic.version = 11 : i64} {
  func.func @_fused_hypernet_kernel(%arg0: i32, %arg1: memref<8x32xf32, #tpu.memory_space<vmem>>, %arg2: memref<1x32x64xbf16, #tpu.memory_space<vmem>>, %arg3: memref<1x1x64xf32, #tpu.memory_space<vmem>>, %arg4: memref<1x64x64xbf16, #tpu.memory_space<vmem>>, %arg5: memref<1x1x64xf32, #tpu.memory_space<vmem>>, %arg6: memref<1x64x128xbf16, #tpu.memory_space<vmem>>, %arg7: memref<1x1x128xf32, #tpu.memory_space<vmem>>, %arg8: memref<8x128xf32, #tpu.memory_space<vmem>>) attributes {dimension_semantics = [#tpu.dimension_semantics<parallel>], iteration_bounds = array<i64: 4>, scalar_prefetch = 0 : i64, scratch_operands = 0 : i64, tpu.core_type = #tpu.core_type<tc>, window_params = [{pipeline_mode = #tpu.pipeline_mode<synchronous>, transform_indices = @transform_0, window_bounds = array<i64: 8, 32>}, {transform_indices = @transform_1, window_bounds = array<i64: 1, 32, 64>}, {transform_indices = @transform_2, window_bounds = array<i64: 1, 1, 64>}, {transform_indices = @transform_3, window_bounds = array<i64: 1, 64, 64>}, {transform_indices = @transform_4, window_bounds = array<i64: 1, 1, 64>}, {transform_indices = @transform_5, window_bounds = array<i64: 1, 64, 128>}, {transform_indices = @transform_6, window_bounds = array<i64: 1, 1, 128>}, {transform_indices = @transform_7, window_bounds = array<i64: 8, 128>}]} {
    %c0 = arith.constant 0 : index
    %c0_0 = arith.constant 0 : index
    %0 = vector.load %arg1[%c0, %c0_0] : memref<8x32xf32, #tpu.memory_space<vmem>>, vector<8x32xf32>
    %c0_1 = arith.constant 0 : index
    %c0_2 = arith.constant 0 : index
    %c0_3 = arith.constant 0 : index
    %1 = vector.load %arg2[%c0_1, %c0_2, %c0_3] : memref<1x32x64xbf16, #tpu.memory_space<vmem>>, vector<1x32x64xbf16>
    %2 = vector.shape_cast %1 : vector<1x32x64xbf16> to vector<32x64xbf16>
    %c0_4 = arith.constant 0 : index
    %c0_5 = arith.constant 0 : index
    %c0_6 = arith.constant 0 : index
    %3 = vector.load %arg3[%c0_4, %c0_5, %c0_6] : memref<1x1x64xf32, #tpu.memory_space<vmem>>, vector<1x1x64xf32>
    %4 = vector.shape_cast %3 : vector<1x1x64xf32> to vector<1x64xf32>
    %5 = arith.truncf %0 : vector<8x32xf32> to vector<8x32xbf16>
    %cst = arith.constant dense<0.000000e+00> : vector<8x64xf32>
    %6 = tpu.matmul %5, %2, %cst {dimension_numbers = #tpu.dot_dimension_numbers<[1], [0], [0], [1], [0, 0, 1, 1], [], []>} : vector<8x32xbf16>, vector<32x64xbf16>, vector<8x64xf32> -> vector<8x64xf32>
    %7 = vector.broadcast %4 : vector<1x64xf32> to vector<8x64xf32>
    %8 = arith.addf %6, %7 : vector<8x64xf32>
    %cst_7 = arith.constant 0.000000e+00 : f32
    %9 = vector.broadcast %cst_7 : f32 to vector<8x64xf32>
    %10 = arith.maximumf %8, %9 : vector<8x64xf32>
    %c0_8 = arith.constant 0 : index
    %c0_9 = arith.constant 0 : index
    %c0_10 = arith.constant 0 : index
    %11 = vector.load %arg4[%c0_8, %c0_9, %c0_10] : memref<1x64x64xbf16, #tpu.memory_space<vmem>>, vector<1x64x64xbf16>
    %12 = vector.shape_cast %11 : vector<1x64x64xbf16> to vector<64x64xbf16>
    %c0_11 = arith.constant 0 : index
    %c0_12 = arith.constant 0 : index
    %c0_13 = arith.constant 0 : index
    %13 = vector.load %arg5[%c0_11, %c0_12, %c0_13] : memref<1x1x64xf32, #tpu.memory_space<vmem>>, vector<1x1x64xf32>
    %14 = vector.shape_cast %13 : vector<1x1x64xf32> to vector<1x64xf32>
    %15 = arith.truncf %10 : vector<8x64xf32> to vector<8x64xbf16>
    %cst_14 = arith.constant dense<0.000000e+00> : vector<8x64xf32>
    %16 = tpu.matmul %15, %12, %cst_14 {dimension_numbers = #tpu.dot_dimension_numbers<[1], [0], [0], [1], [0, 0, 1, 1], [], []>} : vector<8x64xbf16>, vector<64x64xbf16>, vector<8x64xf32> -> vector<8x64xf32>
    %17 = vector.broadcast %14 : vector<1x64xf32> to vector<8x64xf32>
    %18 = arith.addf %16, %17 : vector<8x64xf32>
    %cst_15 = arith.constant 0.000000e+00 : f32
    %19 = vector.broadcast %cst_15 : f32 to vector<8x64xf32>
    %20 = arith.maximumf %18, %19 : vector<8x64xf32>
    %c0_16 = arith.constant 0 : index
    %c0_17 = arith.constant 0 : index
    %c0_18 = arith.constant 0 : index
    %21 = vector.load %arg6[%c0_16, %c0_17, %c0_18] : memref<1x64x128xbf16, #tpu.memory_space<vmem>>, vector<1x64x128xbf16>
    %22 = vector.shape_cast %21 : vector<1x64x128xbf16> to vector<64x128xbf16>
    %c0_19 = arith.constant 0 : index
    %c0_20 = arith.constant 0 : index
    %c0_21 = arith.constant 0 : index
    %23 = vector.load %arg7[%c0_19, %c0_20, %c0_21] : memref<1x1x128xf32, #tpu.memory_space<vmem>>, vector<1x1x128xf32>
    %24 = vector.shape_cast %23 : vector<1x1x128xf32> to vector<1x128xf32>
    %25 = arith.truncf %20 : vector<8x64xf32> to vector<8x64xbf16>
    %cst_22 = arith.constant dense<0.000000e+00> : vector<8x128xf32>
    %26 = tpu.matmul %25, %22, %cst_22 {dimension_numbers = #tpu.dot_dimension_numbers<[1], [0], [0], [1], [0, 0, 1, 1], [], []>} : vector<8x64xbf16>, vector<64x128xbf16>, vector<8x128xf32> -> vector<8x128xf32>
    %27 = vector.broadcast %24 : vector<1x128xf32> to vector<8x128xf32>
    %28 = arith.addf %26, %27 : vector<8x128xf32>
    %c0_23 = arith.constant 0 : index
    %c0_24 = arith.constant 0 : index
    %29 = vector.load %arg8[%c0_23, %c0_24] : memref<8x128xf32, #tpu.memory_space<vmem>>, vector<8x128xf32>
    tpu.vector_store %arg8[%c0_23, %c0_24], %28 {strides = array<i32>} : memref<8x128xf32, #tpu.memory_space<vmem>>, vector<8x128xf32>,
    return
  }
  func.func @transform_0(%arg0: i32) -> (i32, i32) {
    %c0_i32 = arith.constant 0 : i32
    %c0_i32_0 = arith.constant 0 : i32
    %c0_i32_1 = arith.constant 0 : i32
    return %c0_i32, %c0_i32_0 : i32, i32
  }
  func.func @transform_1(%arg0: i32) -> (i32, i32, i32) {
    %c0_i32 = arith.constant 0 : i32
    %c0_i32_0 = arith.constant 0 : i32
    %c0_i32_1 = arith.constant 0 : i32
    return %arg0, %c0_i32, %c0_i32_0 : i32, i32, i32
  }
  func.func @transform_2(%arg0: i32) -> (i32, i32, i32) {
    %c0_i32 = arith.constant 0 : i32
    %c0_i32_0 = arith.constant 0 : i32
    %c0_i32_1 = arith.constant 0 : i32
    return %arg0, %c0_i32, %c0_i32_0 : i32, i32, i32
  }
  func.func @transform_3(%arg0: i32) -> (i32, i32, i32) {
    %c0_i32 = arith.constant 0 : i32
    %c0_i32_0 = arith.constant 0 : i32
    %c0_i32_1 = arith.constant 0 : i32
    return %arg0, %c0_i32, %c0_i32_0 : i32, i32, i32
  }
  func.func @transform_4(%arg0: i32) -> (i32, i32, i32) {
    %c0_i32 = arith.constant 0 : i32
    %c0_i32_0 = arith.constant 0 : i32
    %c0_i32_1 = arith.constant 0 : i32
    return %arg0, %c0_i32, %c0_i32_0 : i32, i32, i32
  }
  func.func @transform_5(%arg0: i32) -> (i32, i32, i32) {
    %c0_i32 = arith.constant 0 : i32
    %c0_i32_0 = arith.constant 0 : i32
    %c0_i32_1 = arith.constant 0 : i32
    return %arg0, %c0_i32, %c0_i32_0 : i32, i32, i32
  }
  func.func @transform_6(%arg0: i32) -> (i32, i32, i32) {
    %c0_i32 = arith.constant 0 : i32
    %c0_i32_0 = arith.constant 0 : i32
    %c0_i32_1 = arith.constant 0 : i32
    return %arg0, %c0_i32, %c0_i32_0 : i32, i32, i32
  }
  func.func @transform_7(%arg0: i32) -> (i32, i32) {
    %c0_i32 = arith.constant 0 : i32
    %c0_i32_0 = arith.constant 0 : i32
    return %c0_i32, %arg0 : i32, i32
  }
}

</mosaic_0001>

<bundles_post_ra>
// kernel: tpu_custom_call.1
= control target key start
LH: loop header
LB: loop body
LE: loop exit
PB: predicated region body
PF: predicated region fallthrough
CT: control target
= control target key end

     0   :  { %s1572_s0 = inlined_call_operand.hbm [shape: f32[8,32], index: 0, kind: input, shape index: {}]   ;;  %s1573_s1 = inlined_call_operand.hbm [shape: bf16[4,32,64], index: 1, kind: input, shape index: {}]   ;;  %s1574_s2 = inlined_call_operand.vmem [shape: f32[4,1,64], index: 2, kind: input, shape index: {}]   ;;  %s1575_s3 = inlined_call_operand.hbm [shape: bf16[4,64,64], index: 3, kind: input, shape index: {}]   ;;  %s1576_s4 = inlined_call_operand.vmem [shape: f32[4,1,64], index: 4, kind: input, shape index: {}]   ;;  %s1577_s5 = inlined_call_operand.hbm [shape: bf16[4,64,128], index: 5, kind: input, shape index: {}]   ;;  %s1578_s6 = inlined_call_operand.vmem [shape: f32[4,1,128], index: 6, kind: input, shape index: {}]   ;;  %s1579_s7 = inlined_call_operand.hbm [shape: f32[8,512], index: 7, kind: output, shape index: {}]  }
   0x1   :  { %1598 = sst [smem:[#allocation18_spill]] %s1573_s1 }
   0x2   :  { %1599 = sst [smem:[#allocation19_spill]] %s1575_s3 }
   0x3   :  { %12 = vsyncpa [#allocation3], 0 }
   0x4   :  { %13 = vsyncpa [#allocation6], 0 }
   0x5   :  { %15 = vsyncpa [#allocation6 + $0x1], 0 }
   0x6   :  { %16 = vsyncpa [#allocation9], 0 }
   0x7   :  { %18 = vsyncpa [#allocation9 + $0x1], 0 }
   0x8   :  { %19 = vsyncpa [#allocation4], 0 }
   0x9   :  { %21 = vsyncpa [#allocation4 + $0x1], 0  ;;  %s1246_s24 = smov 0   ;;  %s1248_s25 = smov 0  }
   0xa   :  { %s1250_s26 = smov 0   ;;  %s1252_s27 = smov 0  }
   0xb LB: > { %1600 = sst [smem:[#allocation15_spill]] %s1191_s26  ;;  %s1267_s28 = sadd.s32 1, %s1195_s27   ;;  %s1195_s27 = sphi %s1252_s27, %s1626_s27   ;;  %s1191_s26 = sphi %s1250_s26, %s1628_s26   ;;  %s1187_s25 = sphi %s1248_s25, %s1630_s25   ;;  %s1183_s24 = sphi %s1246_s24, %s1629_s24  }
   0xc   : > { %1601 = sst [smem:[#allocation16_spill]] %s1267_s28  ;;  %s55_s29 = sadd.s32 1, %s1191_s26 }
   0xd   : > { %s52_s30 = ssub.s32 %s1195_s27, %s1267_s28  ;;  %p1580_p0 = scmp.ne.s32.totalorder %s1191_s26, %s1187_s25 }
   0xe   : > { %p53_p1 = scmp.eq.s32.totalorder %s52_s30, 0  ;;  %p63_p2 = scmp.eq.s32.totalorder %s1195_s27, 0 }
   0xf   : > { %p953_p3 = scmp.lt.s32.totalorder %s1195_s27, 4  ;;  %s259_s9 = sand.u32 1, %s1195_s27  }
  0x10   : > { %s1277_s8 = scalar_select %p53_p1, %s1191_s26, %s55_s29  }
  0x11   : > { %p64_p4 = por %p63_p2, %p1580_p0  ;;  %s1284_s10 = sand.u32 1, %s1191_s26  }
  0x12   : > { %1602 = sst [smem:[#allocation17_spill]] %s1277_s8  ;;  %s839_s11 = sshll.u32 %s1284_s10, 4 }
  0x13   : > { %s874_s12 = sshll.u32 %s1195_s27, 8  ;;  %s1603_s1 = sld [smem:[#allocation18_spill]] }
  0x14   : > { %s263_s16 = scalar_lea.vmem [#allocation5], %s839_s11  ;;  %p1293_p5 = pnand %p953_p3, %p64_p4 }
  0x15   : > { %s270_s17 = sshll.u32 %s263_s16, 4  ;;  %s1299_s19 = scalar_lea.sflag [#allocation6], %s259_s9  ;;  %s1297_s17 = int_to_ptr.vmem [resolvable:$true] %s270_s17 }
  0x16   : > { %s1604_s18 = scalar_select %p1293_p5, 1, 0 }
  0x17   : > { %p1305_p7 = pneg %p1293_p5 }
  0x19   : > { %s1291_s15 = scalar_lea.hbm %s1603_s1, %s874_s12  ;;  %s1008_s29 = scalar_lea.hbm %s1603_s1, 1024 }
  0x1a   : > { %s1003_s20 = scalar_lea.hbm %s1291_s15, 256  ;;  %p1009_p10 = scmp.lt.u32.totalorder %s1291_s15, %s1603_s1 }
  0x1b   : > { %p1004_p6 = scmp.ne.s32.totalorder %s1291_s15, %s1003_s20  ;;  %p1010_p11 = scmp.lt.u32.totalorder %s1008_s29, %s1003_s20 }
  0x1c   : > { %s1605_s21 = scalar_select %p1305_p7, 1, 0 }
  0x1d   : > { %p1006_p8 = pnand %p1305_p7, %p1004_p6  ;;  %p1011_p12 = por %p1010_p11, %p1009_p10 }
  0x1e   : > { %p1012_p13 = scmp.lt.u32.totalorder %s1003_s20, %s1291_s15 }
  0x1f   : > { %p1007_p9 = pneg %p1006_p8 }
  0x20   : > { %p1013_p1 = por %p1012_p13, %p1011_p12 }
  0x22   : > { %p1014_p2 = pnand %p1013_p1, %p1007_p9 }
  0x24   : > { %1017 = shalt.err (!%p1014_p2)
}
  0x25   : > { %s1018_s9 = scalar_lea.vmem %s1297_s17, 256  ;;  %s1197_s12 = smov [#allocation5]  }
  0x26   : > { %p1019_p3 = scmp.ne.s32.totalorder %s1297_s17, %s1018_s9  ;;  %s1023_s13 = sshll.u32 %s1197_s12, 4  ;;  %s1024_s13 = int_to_ptr.vmem [resolvable:$false] %s1023_s13 }
  0x27   : > { %s1025_s14 = scalar_lea.vmem %s1024_s13, 512  ;;  %p1026_p8 = scmp.lt.s32.totalorder %s1297_s17, %s1024_s13 }
  0x28   : > { %p1021_p4 = pnand %p1019_p3, %p1305_p7  ;;  %p1027_p0 = scmp.lt.s32.totalorder %s1025_s14, %s1018_s9 }
  0x2a   : > { %p1022_p6 = pneg %p1021_p4  ;;  %p1028_p10 = por %p1027_p0, %p1026_p8 }
  0x2c   : > { %p1029_p11 = pnand %p1028_p10, %p1022_p6 }
  0x2e   : > { %1032 = shalt.err (!%p1029_p11)
}
  0x2f   : > { %s1581_s16 = smov 64   ;;  %s1583_s20 = smov 4  }
  0x30   : > { %941 = dma.hbm_to_vmem [thread:$0]  (!%p1293_p5), %s1291_s15, 256, %s1297_s17, %s1299_s19, %s1581_s16, %s1581_s16, %s1583_s20  }
  0x31   : > { %s1333_s22 = sadd.s32 4294967295, %s1195_s27   ;;  %s835_s23 = sadd.s32 4294967294, %s1195_s27  }
  0x32   : > { %p68_p0 = scmp.ne.s32.totalorder %s1187_s25, %s1183_s24  ;;  %p1589_p9 = scmp.eq.s32.totalorder %s1333_s22, 0 }
  0x33   : > { %p222_p12 = scmp.eq.s32.totalorder %s1333_s22, 3  ;;  %p228_p13 = scmp.eq.s32.totalorder %s835_s23, 3 }
  0x34   : > { %p1342_p1 = por %p1589_p9, %p68_p0  ;;  %p836_p2 = scmp.ge.s32.totalorder %s1195_s27, 1 }
  0x35   : > { %p1607_p3 = scmp.ne.s32.totalorder %s1191_s26, %s1187_s25  ;;  %p1354_p6 = por %p228_p13, %p68_p0 }
  0x36   : > { %s1606_s29 = scalar_select %p1342_p1, 1, 0 }
  0x37   : > { %p1350_p4 = por %p222_p12, %p1607_p3  ;;  %p235_p8 = scmp.lt.s32.totalorder %s1195_s27, 5 }
  0x38   : > { %s1609_s17 = scalar_select %p1354_p6, 1, 0 }
  0x39   : > { %s1608_s15 = scalar_select %p1350_p4, 1, 0 }
  0x3a   : > { %s1594_s30 = sshll.u32 %s1284_s10, 5  ;;  %p1360_p10 = pnand %p836_p2, %p235_p8 }
  0x3b   : > { %s1200_s9 = smov [#allocation2]   ;;  %s1585_s13 = sshll.u32 %s1195_s27, 9 }
  0x3c   : > { %s1610_s11 = scalar_select %p1360_p10, 1, 0 }
  0x3d   : > { %s248_s12 = sshll.u32 %s1200_s9, 4  ;;  %p934_p11 = pneg %p1360_p10  ;;  %s1364_s12 = int_to_ptr.vmem [resolvable:$true] %s248_s12 }
  0x3e   : > { %s1611_s3 = sld [smem:[#allocation19_spill]]  ;;  %s290_s20 = scalar_lea.vmem [#allocation7], %s1594_s30 }
  0x3f   : > { %s297_s1 = sshll.u32 %s290_s20, 4  ;;  %p1380_p0 = pnand %p934_p11, %p1589_p9  ;;  %s1384_s1 = int_to_ptr.vmem [resolvable:$true] %s297_s1 }
  0x41   : > { %s1612_s9 = scalar_select %p1380_p0, 1, 0 }
  0x44   : > { %s1374_s16 = scalar_lea.hbm %s1611_s3, %s1585_s13  ;;  %s1038_s13 = scalar_lea.hbm %s1611_s3, 2048 }
  0x45   : > { %s1033_s8 = scalar_lea.hbm %s1374_s16, 512  ;;  %p1039_p3 = scmp.lt.u32.totalorder %s1374_s16, %s1611_s3 }
  0x46   : > { %p1034_p12 = scmp.ne.s32.totalorder %s1374_s16, %s1033_s8  ;;  %p1040_p8 = scmp.lt.u32.totalorder %s1038_s13, %s1033_s8 }
  0x47   : > { %p1042_p9 = scmp.lt.u32.totalorder %s1033_s8, %s1374_s16 }
  0x48   : > { %p1036_p13 = pnand %p1034_p12, %p1305_p7  ;;  %p1041_p11 = por %p1040_p8, %p1039_p3 }
  0x4a   : > { %p1037_p2 = pneg %p1036_p13  ;;  %p1043_p6 = por %p1042_p9, %p1041_p11 }
  0x4c   : > { %p1044_p4 = pnand %p1043_p6, %p1037_p2 }
  0x4e   : > { %1047 = shalt.err (!%p1044_p4)
}
  0x4f   : > { %s1048_s20 = scalar_lea.vmem %s1384_s1, 512  ;;  %s1201_s14 = smov [#allocation7]  }
  0x50   : > { %p1049_p12 = scmp.ne.s32.totalorder %s1384_s1, %s1048_s20  ;;  %s1053_s23 = sshll.u32 %s1201_s14, 4  ;;  %s1054_s23 = int_to_ptr.vmem [resolvable:$false] %s1053_s23 }
  0x51   : > { %s1055_s26 = scalar_lea.vmem %s1054_s23, 1024  ;;  %p1056_p10 = scmp.lt.s32.totalorder %s1384_s1, %s1054_s23 }
  0x52   : > { %p1051_p13 = pnand %p1049_p12, %p1305_p7  ;;  %p1057_p0 = scmp.lt.s32.totalorder %s1055_s26, %s1048_s20 }
  0x54   : > { %p1052_p1 = pneg %p1051_p13  ;;  %p1058_p3 = por %p1057_p0, %p1056_p10 }
  0x56   : > { %p1059_p8 = pnand %p1058_p3, %p1052_p1 }
  0x58   : > { %1062 = shalt.err (!%p1059_p8)
}
  0x59   : > { %s1613_s28 = smov 4   ;;  %s1614_s8 = smov 64  }
  0x5a   : > { %944 = dma.hbm_to_vmem [thread:$0]  (!%p1293_p5), %s1374_s16, 512, %s1384_s1, %s1299_s19, %s1614_s8, %s1614_s8, %s1613_s28  }
  0x5b   : > { %s1063_s14 = scalar_lea.hbm %s1572_s0, 128  ;;  %p1615_p1 = scmp.ne.s32.totalorder %s1612_s9, 0 }
  0x5c   : > { %p1064_p9 = scmp.ne.s32.totalorder %s1572_s0, %s1063_s14  ;;  %p1070_p0 = scmp.lt.u32.totalorder %s1063_s14, %s1572_s0 }
  0x5d   : > { %p1065_p4 = pneg %p1615_p1 }
  0x5f   : > { %p1066_p6 = pnand %p1065_p4, %p1064_p9 }
  0x61   : > { %p1067_p10 = pneg %p1066_p6 }
  0x63   : > { %p1072_p2 = pnand %p1070_p0, %p1067_p10 }
  0x65   : > { %1075 = shalt.err (!%p1072_p2)
}
  0x66   : > { %s1076_s1 = scalar_lea.vmem %s1364_s12, 128  ;;  %p1084_p3 = scmp.lt.s32.totalorder %s1364_s12, %s1364_s12 }
  0x67   : > { %p1077_p11 = scmp.ne.s32.totalorder %s1364_s12, %s1076_s1  ;;  %p1085_p8 = scmp.lt.s32.totalorder %s1076_s1, %s1076_s1 }
  0x69   : > { %p1079_p12 = pnand %p1077_p11, %p1065_p4  ;;  %p1086_p5 = por %p1085_p8, %p1084_p3 }
  0x6b   : > { %p1080_p13 = pneg %p1079_p12 }
  0x6d   : > { %p1087_p7 = pnand %p1086_p5, %p1080_p13 }
  0x6f   : > { %1090 = shalt.err (!%p1087_p7)
}
  0x70   : > { %937 = dma.hbm_to_vmem [thread:$0]  (!%p1615_p1), %s1572_s0, 128, %s1364_s12, [#allocation3]  }
  0x71   : > { %s1616_s16 = sshll.u32 %s1195_s27, 9  ;;  %s1617_s23 = sshll.u32 %s1284_s10, 5 }
  0x72   : > { %s1437_s14 = scalar_lea.hbm %s1577_s5, %s1616_s16  ;;  %s317_s9 = scalar_lea.vmem [#allocation8], %s1617_s23 }
  0x73   : > { %s324_s20 = sshll.u32 %s317_s9, 4  ;;  %s314_s26 = scalar_lea.sflag [#allocation9], %s1284_s10  ;;  %s1441_s20 = int_to_ptr.vmem [resolvable:$true] %s324_s20 }
  0x74   : > { %s1091_s1 = scalar_lea.hbm %s1437_s14, 512  ;;  %p1618_p7 = scmp.ne.s32.totalorder %s1605_s21, 0 }
  0x75   : > { %p1092_p5 = scmp.ne.s32.totalorder %s1437_s14, %s1091_s1  ;;  %s1096_s19 = scalar_lea.hbm %s1577_s5, 2048 }
  0x76   : > { %p1097_p4 = scmp.lt.u32.totalorder %s1437_s14, %s1577_s5  ;;  %p1098_p6 = scmp.lt.u32.totalorder %s1096_s19, %s1091_s1 }
  0x77   : > { %p1094_p9 = pnand %p1092_p5, %p1618_p7  ;;  %p1100_p0 = scmp.lt.u32.totalorder %s1091_s1, %s1437_s14 }
  0x78   : > { %p1099_p10 = por %p1098_p6, %p1097_p4 }
  0x79   : > { %p1095_p1 = pneg %p1094_p9 }
  0x7a   : > { %p1101_p2 = por %p1100_p0, %p1099_p10 }
  0x7c   : > { %p1102_p11 = pnand %p1101_p2, %p1095_p1 }
  0x7e   : > { %1105 = shalt.err (!%p1102_p11)
}
  0x7f   : > { %s1106_s13 = scalar_lea.vmem %s1441_s20, 512  ;;  %s1202_s23 = smov [#allocation8]  }
  0x80   : > { %p1107_p12 = scmp.ne.s32.totalorder %s1441_s20, %s1106_s13  ;;  %s1111_s9 = sshll.u32 %s1202_s23, 4  ;;  %s1112_s9 = int_to_ptr.vmem [resolvable:$false] %s1111_s9 }
  0x81   : > { %s1113_s12 = scalar_lea.vmem %s1112_s9, 1024  ;;  %p1114_p8 = scmp.lt.s32.totalorder %s1441_s20, %s1112_s9 }
  0x82   : > { %p1109_p13 = pnand %p1107_p12, %p1618_p7  ;;  %p1115_p5 = scmp.lt.s32.totalorder %s1113_s12, %s1106_s13 }
  0x84   : > { %p1110_p3 = pneg %p1109_p13  ;;  %p1116_p9 = por %p1115_p5, %p1114_p8 }
  0x86   : > { %p1117_p4 = pnand %p1116_p9, %p1110_p3 }
  0x88   : > { %1120 = shalt.err (!%p1117_p4)
}
  0x89   : > { %p1619_p1 = scmp.ne.s32.totalorder %s1604_s18, 0  ;;  %p1620_p7 = scmp.ne.s32.totalorder %s1610_s11, 0 }
  0x8a   : > { %p1621_p6 = scmp.eq.s32.totalorder (!%p1620_p7), %s1333_s22, 0 }
  0x8b   : > { %947 = dma.hbm_to_vmem [thread:$0]  (!%p1619_p1), %s1437_s14, 512, %s1441_s20, %s314_s26, %s1614_s8, %s1614_s8, %s1613_s28  }
  0x8c   : > { %342 = sbr.rel (%p1620_p7) target bundleno = 830 (0x33e), region = 48 }
  0x93   : > { %1166 = dma.done.wait (%p1621_p6), [#allocation3], 128   ;;  %p1622_p10 = pmov %p1621_p6 }
  0x94   : > { %s348_s18 = sand.u32 1, %s1333_s22   ;;  %s1478_s21 = sand.u32 1, %s1187_s25  }
  0x95   : > { %1168 = vsyncadd (%p1622_p10), [#allocation3], 4294967168  ;;  %s850_s10 = sshll.u32 %s1478_s21, 4  ;;  %s349_s1 = scalar_lea.sflag [#allocation6], %s348_s18 }
  0x96   : > { %s352_s3 = scalar_lea.vmem [#allocation5], %s850_s10  ;;  %p1623_p0 = scmp.ne.s32.totalorder %s1606_s29, 0 }
  0x98   : > { %1170 = dma.done.wait (%p1623_p0), %s349_s1, 768  }
  0x99   : > { %1172 = vsyncadd (%p1623_p0), %s349_s1, 4294966528  ;;  %s851_s11 = sshll.u32 %s1478_s21, 5  ;;  %s367_s8 = scalar_lea.sflag [#allocation9], %s1478_s21 }
  0x9a   : > { %s1486_s28 = scalar_lea.vmem [#allocation7], %s851_s11  ;;  %s1489_s14 = scalar_lea.vmem [#allocation8], %s851_s11 }
  0x9b   : > { %1174 = dma.done.wait (%p1623_p0), %s367_s8, 512  }
  0x9c   : > { %1176 = vsyncadd (%p1623_p0), %s367_s8, 4294966784  ;;  %v1203_v0 = vmov 0.0   ;;  %vm1204_vm0 = vmmov 0   ;;  %v993_v1 = vld [vmem:[%s352_s3] sm:$0xff]   ;;  %v994_v2 = vld [vmem:[%s352_s3 + $0x8] sm:$0xff]   ;;  %vm455_vm1 = vcmask 261120  }
  0x9d   : > { %890 = vmatprep.subr.bf16.mxu0 %v1203_v0  ;;  %894 = vmatprep.mubr.msk.bf16.mxu0 %vm1204_vm0, %v1203_v0  ;;  %v430_v3 = vld [vmem:[#allocation2] sm:$0xff]  ;;  %v995_v4 = vld [vmem:[%s1486_s28] sm:$0xff]   ;;  %v996_v5 = vld [vmem:[%s1486_s28 + $0x8] sm:$0xff]   ;;  %p420_p2 = scmp.lt.s32.totalorder %s1333_s22, 3  ;;  %vm540_vm2 = vcmask 523264   ;;  %s853_s23 = sshll.u32 %s1478_s21, 3 }
  0x9e   : > { %898 = vmatprep.subr.bf16.mxu1 %v1203_v0  ;;  %906 = vmatprep.mubr.msk.bf16.mxu1 %vm1204_vm0, %v1203_v0  ;;  %v436_v6 = vpack.c.bf16 %v430_v3, %v430_v3  ;;  %v997_v7 = vld [vmem:[%s1486_s28 + $0x10] sm:$0xff]   ;;  %v998_v8 = vld [vmem:[%s1486_s28 + $0x18] sm:$0xff]   ;;  %v999_v9 = vld [vmem:[%s1489_s14] sm:$0xff]   ;;  %s871_s10 = sshll.u32 %s1333_s22, 7  ;;  %s419_s1 = scalar_lea.vmem [#allocation10], %s853_s23 }
  0x9f   : > { %891 = vmatpush3.bf16.msra.mxu0 %v993_v1  ;;  %899 = vmatpush3.bf16.msra.mxu1 %v995_v4  ;;  %v1000_v10 = vld [vmem:[%s1489_s14 + $0x8] sm:$0xff]   ;;  %s1506_s29 = scalar_select %p420_p2, %s1333_s22, 3  ;;  %v1001_v19 = vld [vmem:[%s1489_s14 + $0x10] sm:$0xff]   ;;  %v1002_v20 = vld [vmem:[%s1489_s14 + $0x18] sm:$0xff]  }
  0xa0   : > { %892 = vmatprep.subr.bf16.mxu0 %v1203_v0  ;;  %900 = vmatprep.subr.bf16.mxu1 %v1203_v0  ;;  %s683_s3 = sshll.u32 %s419_s1, 4  ;;  %s1529_s8 = scalar_lea.hbm %s1579_s7, %s871_s10  ;;  %s1531_s3 = int_to_ptr.vmem [resolvable:$true] %s683_s3 }
  0xa1   : > { %s422_s19 = scalar_lea.vmem %s1574_s2, %s1506_s29  ;;  %s425_s13 = scalar_lea.vmem %s1576_s4, %s1506_s29 }
  0xa2   : > { %v854_v11 = vld [vmem:[%s422_s19] ss:$0 sm:$0xff]  ;;  %s428_s18 = scalar_lea.vmem %s1578_s6, %s1506_s29  ;;  %s670_s14 = scalar_lea.sflag [#allocation4], %s1478_s21 }
  0xa3   : > { %893 = vmatpush3.bf16.msra.mxu0 %v994_v2  ;;  %901 = vmatpush3.bf16.msra.mxu1 %v996_v5  ;;  %v858_v21 = vld [vmem:[%s425_s13] ss:$0 sm:$0xff]  ;;  %s1121_s22 = scalar_lea.vmem %s1531_s3, 128  ;;  %p1624_p12 = scmp.ne.s32.totalorder %s1608_s15, 0 }
  0xa4   : > { %910 = vmatprep.subr.bf16.mxu0 %v1203_v0  ;;  %902 = vmatprep.subr.bf16.mxu1 %v1203_v0  ;;  %v864_v29 = vld [vmem:[%s428_s18] ss:$0 sm:$0xff]  ;;  %p1122_p11 = scmp.ne.s32.totalorder %s1531_s3, %s1121_s22  ;;  %s1205_s29 = smov [#allocation10]  }
  0xa5   : > { %s1125_s20 = sshll.u32 %s1205_s29, 4  ;;  %s1126_s20 = int_to_ptr.vmem [resolvable:$false] %s1125_s20 }
  0xa6   : > { %895 = vmatmul.mubr.msk.bf16.vlgmr.msra.gmra.mrb[0].mxu0 %vm455_vm1, %v436_v6  ;;  %p1123_p13 = pnand %p1122_p11, %p1624_p12  ;;  %s1127_s26 = scalar_lea.vmem %s1126_s20, 256 }
  0xa7   : > { %918 = vmatprep.mubr.msk.bf16.mxu0 %vm1204_vm0, %v1203_v0  ;;  %903 = vmatpush3.bf16.msra.mxu1 %v997_v7  ;;  %p1128_p8 = scmp.lt.s32.totalorder %s1531_s3, %s1126_s20  ;;  %p1129_p5 = scmp.lt.s32.totalorder %s1127_s26, %s1121_s22 }
  0xa8   : > { %904 = vmatprep.subr.bf16.mxu1 %v1203_v0  ;;  %911 = vmatpush3.bf16.msra.mxu0 %v999_v9  ;;  %p1124_p3 = pneg %p1123_p13 }
  0xa9   : > { %912 = vmatprep.subr.bf16.mxu0 %v1203_v0  ;;  %p1130_p9 = por %p1129_p5, %p1128_p8 }
  0xab   : > { %905 = vmatpush3.bf16.msra.mxu1 %v998_v8  ;;  %p1131_p4 = pnand %p1130_p9, %p1124_p3 }
  0xac   : > { %913 = vmatpush3.bf16.msra.mxu0 %v1000_v10 }
  0xad   : > { %914 = vmatprep.subr.bf16.mxu0 %v1203_v0 }
  0xb0   : > { %915 = vmatpush3.bf16.msra.mxu0 %v1001_v19 }
  0xb1   : > { %916 = vmatprep.subr.bf16.mxu0 %v1203_v0 }
  0xb4   : > { %917 = vmatpush3.bf16.msra.mxu0 %v1002_v20 }
 0x179   : > { %v493_v12 = vpop.f32.mrb[0].mxu0 }
 0x17a   : > { %v494_v13 = vadd.f32 %v854_v11, %v493_v12  ;;  %v896_v14 = vpop.f32.mrb[1].mxu0 }
 0x17b   : > { %v496_v15 = vpop.f32.mrb[2].mxu0 }
 0x17c   : > { %v499_v16 = vmax.f32 %v494_v13, 0.0  ;;  %v897_v17 = vpop.f32.mrb[3].mxu0 }
 0x17e   : > { %v509_v18 = vpack.c.bf16 %v499_v16, %v499_v16 }
 0x180   : > { %907 = vmatmul.mubr.msk.bf16.vlgmr.msra.gmra.mrb[0].mxu1 %vm540_vm2, %v509_v18 }
 0x253   : > { %v578_v22 = vpop.f32.mrb[0].mxu1 }
 0x254   : > { %v579_v23 = vadd.f32 %v858_v21, %v578_v22  ;;  %v908_v24 = vpop.f32.mrb[1].mxu1 }
 0x255   : > { %v581_v25 = vpop.f32.mrb[2].mxu1 }
 0x256   : > { %v584_v26 = vmax.f32 %v579_v23, 0.0  ;;  %v909_v27 = vpop.f32.mrb[3].mxu1 }
 0x258   : > { %v594_v28 = vpack.c.bf16 %v584_v26, %v584_v26 }
 0x25a   : > { %919 = vmatmul.mubr.msk.bf16.vlgmr.msra.gmra.mrb[4].mxu0 %vm540_vm2, %v594_v28 }
 0x32d   : > { %v662_v30 = vpop.f32.mrb[4].mxu0 }
 0x32e   : > { %v663_v31 = vadd.f32 %v864_v29, %v662_v30  ;;  %v920_v32 = vpop.f32.mrb[5].mxu0 }
 0x32f   : > { %v665_v33 = vpop.f32.mrb[6].mxu0 }
 0x330   : > { %668 = vst [vmem:[%s419_s1] sm:$0xff] %v663_v31  ;;  %v921_v34 = vpop.f32.mrb[7].mxu0 }
 0x331   : > { %1134 = shalt.err (!%p1131_p4)
}
 0x332   : > { %s1135_s21 = scalar_lea.hbm %s1529_s8, 128  ;;  %s1139_s30 = scalar_lea.hbm %s1579_s7, 512 }
 0x333   : > { %p1136_p1 = scmp.ne.s32.totalorder %s1529_s8, %s1135_s21  ;;  %p1140_p10 = scmp.lt.u32.totalorder %s1529_s8, %s1579_s7 }
 0x334   : > { %p1141_p0 = scmp.lt.u32.totalorder %s1139_s30, %s1135_s21  ;;  %p1143_p11 = scmp.lt.u32.totalorder %s1135_s21, %s1529_s8 }
 0x335   : > { %p1137_p7 = pnand %p1136_p1, %p1624_p12 }
 0x336   : > { %p1142_p2 = por %p1141_p0, %p1140_p10 }
 0x337   : > { %p1138_p6 = pneg %p1137_p7 }
 0x338   : > { %p1144_p13 = por %p1143_p11, %p1142_p2 }
 0x33a   : > { %p1145_p3 = pnand %p1144_p13, %p1138_p6 }
 0x33c   : > { %1148 = shalt.err (!%p1145_p3)
}
 0x33d   : > { %932 = dma.vmem_to_hbm [thread:$0]  (%p1624_p12), %s1531_s3, 128, %s1529_s8, %s670_s14  }
 0x33e PF: > { %p955_p8 = scmp.ge.s32.totalorder %s1195_s27, 2  ;;  %s695_s9 = sand.u32 1, %s1183_s24  }
 0x33f   : > { %p1625_p5 = scmp.ne.s32.totalorder %s1609_s17, 0  ;;  %s696_s12 = scalar_lea.sflag [#allocation4], %s695_s9 }
 0x341   : > { %p949_p9 = pnand %p955_p8, %p1625_p5 }
 0x343   : > { %1178 = dma.done.wait (!%p949_p9), %s696_s12, 128  }
 0x344   : > { %1180 = vsyncadd (!%p949_p9), %s696_s12, 4294967168  ;;  %s1626_s27 = sld [smem:[#allocation16_spill]]  ;;  %s1627_s18 = sld [smem:[#allocation15_spill]] }
 0x345   : > { %s1628_s26 = sld [smem:[#allocation17_spill]]  ;;  %s1629_s24 = smov %s1187_s25 }
 0x34a   : > { %p24_p4 = scmp.ge.s32.totalorder %s1626_s27, 6   ;;  %s1630_s25 = smov %s1627_s18 }
 0x34c   :  { %26 = sbr.rel (!%p24_p4) target bundleno = 11 (0xb), region = 131 }
 0x353   :  { %701 = vsyncpa [#allocation3], 1 }
 0x354   :  { %703 = vsyncpa [#allocation3 + $0x1], 1 }
 0x355   :  { %704 = vsyncpa [#allocation6], 1 }
 0x356   :  { %706 = vsyncpa [#allocation6 + $0x1], 1 }
 0x357   :  { %707 = vsyncpa [#allocation9], 1 }
 0x358   :  { %709 = vsyncpa [#allocation9 + $0x1], 1 }
 0x359   :  { %710 = vsyncpa [#allocation4], 1 }
 0x35a   :  { %712 = vsyncpa [#allocation4 + $0x1], 1 }

</bundles_post_ra>
